<compile_context>
chip_gen: v7x
topology: tpu7x:2x2x1
jax: 0.10.0
libtpu: 0.0.40
codegen_flags: <defaults>
</compile_context>

<pallas_src>
import jax
import jax.numpy as jnp
from jax.experimental import pallas as pl
from jax.experimental.pallas import tpu as pltpu


def conv_mlp_kernel(x_ref, w1_ref, b1_ref, w2_ref, b2_ref, o_ref, acc_ref):
    # x_ref:  (C_in, THW)     w1_ref: (T_HID, C_in)   b1_ref: (T_HID, 1)
    # w2_ref: (C_out, T_HID)  b2_ref: (C_out, 1)      o_ref:  (C_out, THW)
    # acc_ref: (C_out, THW) f32 accumulator, resident across the hidden axis.
    k = pl.program_id(2)

    @pl.when(k == 0)
    def _():
        acc_ref[...] = jnp.zeros_like(acc_ref)

    # fc1: 1x1 conv == per-pixel channel matmul on the MXU, f32 accumulation.
    h = jnp.dot(w1_ref[...], x_ref[...], preferred_element_type=jnp.float32)
    # norm = Identity, act = ReLU, drop = Identity (p=0.0); bias + ReLU in f32.
    h = jnp.maximum(h + b1_ref[...], 0.0)
    # fc2 partial product for this hidden-dim slice, accumulated in f32.
    acc_ref[...] += jnp.dot(w2_ref[...], h.astype(w2_ref.dtype),
                            preferred_element_type=jnp.float32)

    @pl.when(k == pl.num_programs(2) - 1)
    def _():
        o_ref[...] = (acc_ref[...] + b2_ref[...]).astype(o_ref.dtype)


def _round_up(x, m):
    return ((x + m - 1) // m) * m


def _vmem_capacity_bytes():
    try:
        return int(pltpu.get_tpu_info().vmem_capacity_bytes)
    except Exception:
        return 64 * 1024 * 1024  # conservative (v7x-sized) fallback


def conv_mlp(x_nchw, w1, b1, w2, b2, *, tile_hw=None, compute_dtype=None,
             vmem_limit_bytes=None):
    """Fused ConvMlp forward.

    x_nchw: (N, C_in, H, W) in PyTorch NCHW order.
    w1: (C_hid, C_in)  == fc1.weight[:, :, 0, 0],  b1: (C_hid,)
    w2: (C_out, C_hid) == fc2.weight[:, :, 0, 0],  b2: (C_out,)
    compute_dtype: optional (e.g. jnp.bfloat16) to run the matmuls on the
      bf16 MXU path; accumulation / bias / ReLU stay in f32.
    Returns (N, C_out, H, W) in the input dtype.
    """
    N, C_in, H, W = x_nchw.shape
    C_hid = w1.shape[0]
    C_out = w2.shape[0]
    HW = H * W
    lane = 128

    out_dtype = x_nchw.dtype
    cdtype = jnp.dtype(compute_dtype) if compute_dtype is not None else \
        jnp.dtype(x_nchw.dtype)

    # Keep NCHW; only flatten spatial dims (a free reshape, no HBM transpose).
    x_rows = x_nchw.reshape(N, C_in, HW).astype(cdtype)
    w1 = w1.astype(cdtype)
    w2 = w2.astype(cdtype)
    b1_2d = b1.astype(jnp.float32).reshape(C_hid, 1)
    b2_2d = b2.astype(jnp.float32).reshape(C_out, 1)

    x_item = jnp.dtype(cdtype).itemsize
    out_item = jnp.dtype(out_dtype).itemsize

    # ---- generation-aware VMEM budget -------------------------------------
    vmem_cap = _vmem_capacity_bytes()   # 128 MiB on v5e/v6e, 64 MiB on v7x
    if vmem_limit_bytes is None:
        budget = max(int(vmem_cap * 0.70), 8 * 1024 * 1024)
    else:
        budget = int(vmem_limit_bytes)

    # ---- spatial / hidden tile selection -----------------------------------
    hw_128 = _round_up(HW, lane)
    if tile_hw is None:
        # Go big by default: in the small-channel regime the kernel is
        # per-step-overhead / DMA bound, so large lane slabs win. The shrink
        # loop below keeps us inside the VMEM budget for large channels.
        thw = min(hw_128, 16384)
    else:
        thw = min(_round_up(int(tile_hw), lane), hw_128)

    # v7x has 2 TensorCores per chip: with a single image, make sure the
    # "parallel" grid has at least two steps so both cores get work.
    if N == 1 and thw >= hw_128 and hw_128 >= 2 * lane:
        thw = _round_up(pl.cdiv(hw_128, 2), lane)

    def vmem_usage(thw_, thid_):
        n_hid_ = C_hid // thid_
        wt_bufs = 1 if n_hid_ == 1 else 2      # constant blocks: single buffer
        x_blk = C_in * thw_ * x_item
        o_blk = C_out * thw_ * out_item
        w_blk = (thid_ * C_in + C_out * thid_) * x_item + (thid_ + C_out) * 4
        h_f32 = thid_ * thw_ * 4               # fc1 output + ReLU intermediate
        acc = C_out * thw_ * 4                 # f32 accumulator scratch
        return 2 * (x_blk + o_blk) + wt_bufs * w_blk + h_f32 + acc

    thid = C_hid
    # 1) shrink the spatial tile toward 2048 lanes,
    while vmem_usage(thw, thid) > budget and thw > 2048:
        thw = max(2048, _round_up(thw // 2, lane))
    # 2) then tile the hidden dim (bounds the f32 intermediate, keeps THW big),
    while (vmem_usage(thw, thid) > budget and thid % 2 == 0
           and (thid // 2) % lane == 0):
        thid //= 2
    # 3) then shrink the spatial tile the rest of the way.
    while vmem_usage(thw, thid) > budget and thw > lane:
        thw = max(lane, _round_up(thw // 2, lane))

    hw_pad = _round_up(HW, thw)
    if hw_pad != HW:
        x_rows = jnp.pad(x_rows, ((0, 0), (0, 0), (0, hw_pad - HW)))
    n_hw = hw_pad // thw
    n_hid = C_hid // thid

    vmem_limit = budget if vmem_limit_bytes is None else int(vmem_limit_bytes)

    # Constant-index blocks never get re-DMA'd: single-buffer them to save
    # VMEM. When the hidden dim is tiled, w1/b1/w2 stream over the k axis and
    # keep the default double-buffering.
    const_mode = dict(pipeline_mode=pl.Buffered(1))
    w_mode = const_mode if n_hid == 1 else {}

    in_specs = [
        pl.BlockSpec((pl.Squeezed(), C_in, thw), lambda n, j, k: (n, 0, j)),
        pl.BlockSpec((thid, C_in), lambda n, j, k: (k, 0), **w_mode),
        pl.BlockSpec((thid, 1), lambda n, j, k: (k, 0), **w_mode),
        pl.BlockSpec((C_out, thid), lambda n, j, k: (0, k), **w_mode),
        pl.BlockSpec((C_out, 1), lambda n, j, k: (0, 0), **const_mode),
    ]
    out_spec = pl.BlockSpec((pl.Squeezed(), C_out, thw),
                            lambda n, j, k: (n, 0, j))

    flops = 2 * N * HW * (C_in * C_hid + C_hid * C_out)
    bytes_accessed = (N * C_in * HW * x_item + N * C_out * HW * out_item
                      + (C_hid * C_in + C_out * C_hid) * x_item
                      + (C_hid + C_out) * 4)

    out = pl.pallas_call(
        conv_mlp_kernel,
        out_shape=jax.ShapeDtypeStruct((N, C_out, hw_pad), out_dtype),
        grid_spec=pltpu.PrefetchScalarGridSpec(
            num_scalar_prefetch=0,
            grid=(N, n_hw, n_hid),
            in_specs=in_specs,
            out_specs=out_spec,
            scratch_shapes=[pltpu.VMEM((C_out, thw), jnp.float32)],
        ),
        compiler_params=pltpu.CompilerParams(
            dimension_semantics=("parallel", "parallel", "arbitrary"),
            vmem_limit_bytes=int(vmem_limit)),
        cost_estimate=pl.CostEstimate(
            flops=flops, transcendentals=0, bytes_accessed=int(bytes_accessed)),
    )(x_rows, w1, b1_2d, w2, b2_2d)

    # Drop spatial padding (if any) and restore NCHW (free reshape).
    return out[:, :, :HW].reshape(N, C_out, H, W)


if __name__ == "__main__":
    # Small shapes consistent with the module's forward.
    N, C_in, H, W = 2, 4, 16, 16
    C_hid, C_out = 32, 4

    key = jax.random.PRNGKey(0)
    k_x, k_w1, k_b1, k_w2, k_b2 = jax.random.split(key, 5)

    x = jax.random.normal(k_x, (N, C_in, H, W), dtype=jnp.float32)
    # Conv2d weights (out, in, 1, 1) stored as (out, in), matching PyTorch.
    w1 = jax.random.normal(k_w1, (C_hid, C_in), dtype=jnp.float32) * 0.1
    b1 = jax.random.normal(k_b1, (C_hid,), dtype=jnp.float32) * 0.1
    w2 = jax.random.normal(k_w2, (C_out, C_hid), dtype=jnp.float32) * 0.1
    b2 = jax.random.normal(k_b2, (C_out,), dtype=jnp.float32) * 0.1

    out = jax.block_until_ready(conv_mlp(x, w1, b1, w2, b2))

    # Pure-JAX reference of the same forward (1x1 conv == channel matmul).
    xr = jnp.transpose(x, (0, 2, 3, 1)).reshape(-1, C_in)
    href = jnp.maximum(xr @ w1.T + b1, 0.0)
    yref = href @ w2.T + b2
    ref = jnp.transpose(yref.reshape(N, H, W, C_out), (0, 3, 1, 2))

    assert out.shape == (N, C_out, H, W)
    assert jnp.allclose(out, ref, atol=1e-5, rtol=1e-5)
    print("KERNEL_OK")
</pallas_src>

<mosaic_0001>
module attributes {stable_mosaic.version = 11 : i64} {
  func.func @conv_mlp_kernel(%arg0: i32, %arg1: i32, %arg2: i32, %arg3: memref<1x4x256xf32, #tpu.memory_space<vmem>>, %arg4: memref<32x4xf32, #tpu.memory_space<vmem>>, %arg5: memref<32x1xf32, #tpu.memory_space<vmem>>, %arg6: memref<4x32xf32, #tpu.memory_space<vmem>>, %arg7: memref<4x1xf32, #tpu.memory_space<vmem>>, %arg8: memref<1x4x256xf32, #tpu.memory_space<vmem>>, %arg9: memref<4x256xf32, #tpu.memory_space<vmem>>) attributes {dimension_semantics = [#tpu.dimension_semantics<parallel>, #tpu.dimension_semantics<parallel>, #tpu.dimension_semantics<arbitrary>], iteration_bounds = array<i64: 2, 1, 1>, scalar_prefetch = 0 : i64, scratch_operands = 1 : i64, tpu.core_type = #tpu.core_type<tc>, window_params = [{transform_indices = @transform_0, window_bounds = array<i64: 1, 4, 256>}, {pipeline_mode = #tpu.pipeline_mode<synchronous>, transform_indices = @transform_1, window_bounds = array<i64: 32, 4>}, {pipeline_mode = #tpu.pipeline_mode<synchronous>, transform_indices = @transform_2, window_bounds = array<i64: 32, 1>}, {pipeline_mode = #tpu.pipeline_mode<synchronous>, transform_indices = @transform_3, window_bounds = array<i64: 4, 32>}, {pipeline_mode = #tpu.pipeline_mode<synchronous>, transform_indices = @transform_4, window_bounds = array<i64: 4, 1>}, {transform_indices = @transform_5, window_bounds = array<i64: 1, 4, 256>}]} {
    %c0_i32 = arith.constant 0 : i32
    %0 = arith.cmpi eq, %arg2, %c0_i32 : i32
    %1 = arith.extui %0 : i1 to i32
    %c0_i32_0 = arith.constant 0 : i32
    %2 = arith.cmpi ne, %1, %c0_i32_0 : i32
    scf.if %2 {
      %cst_17 = arith.constant 0.000000e+00 : f32
      %20 = vector.broadcast %cst_17 : f32 to vector<4x256xf32>
      %c0_18 = arith.constant 0 : index
      %c0_19 = arith.constant 0 : index
      %21 = vector.load %arg9[%c0_18, %c0_19] : memref<4x256xf32, #tpu.memory_space<vmem>>, vector<4x256xf32>
      tpu.vector_store %arg9[%c0_18, %c0_19], %20 {strides = array<i32>} : memref<4x256xf32, #tpu.memory_space<vmem>>, vector<4x256xf32>,
    } else {
    }
    %c0 = arith.constant 0 : index
    %c0_1 = arith.constant 0 : index
    %3 = vector.load %arg4[%c0, %c0_1] : memref<32x4xf32, #tpu.memory_space<vmem>>, vector<32x4xf32>
    %c0_2 = arith.constant 0 : index
    %c0_3 = arith.constant 0 : index
    %c0_4 = arith.constant 0 : index
    %4 = vector.load %arg3[%c0_2, %c0_3, %c0_4] : memref<1x4x256xf32, #tpu.memory_space<vmem>>, vector<1x4x256xf32>
    %5 = vector.shape_cast %4 : vector<1x4x256xf32> to vector<4x256xf32>
    %cst = arith.constant dense<0.000000e+00> : vector<32x256xf32>
    %6 = tpu.matmul %3, %5, %cst {dimension_numbers = #tpu.dot_dimension_numbers<[1], [0], [0], [1], [0, 0, 1, 1], [], []>} : vector<32x4xf32>, vector<4x256xf32>, vector<32x256xf32> -> vector<32x256xf32>
    %c0_5 = arith.constant 0 : index
    %c0_6 = arith.constant 0 : index
    %7 = vector.load %arg5[%c0_5, %c0_6] : memref<32x1xf32, #tpu.memory_space<vmem>>, vector<32x1xf32>
    %8 = vector.broadcast %7 : vector<32x1xf32> to vector<32x256xf32>
    %9 = arith.addf %6, %8 : vector<32x256xf32>
    %cst_7 = arith.constant 0.000000e+00 : f32
    %10 = vector.broadcast %cst_7 : f32 to vector<32x256xf32>
    %11 = arith.maximumf %9, %10 : vector<32x256xf32>
    %c0_8 = arith.constant 0 : index
    %c0_9 = arith.constant 0 : index
    %12 = vector.load %arg9[%c0_8, %c0_9] : memref<4x256xf32, #tpu.memory_space<vmem>>, vector<4x256xf32>
    %c0_10 = arith.constant 0 : index
    %c0_11 = arith.constant 0 : index
    %13 = vector.load %arg6[%c0_10, %c0_11] : memref<4x32xf32, #tpu.memory_space<vmem>>, vector<4x32xf32>
    %cst_12 = arith.constant dense<0.000000e+00> : vector<4x256xf32>
    %14 = tpu.matmul %13, %11, %cst_12 {dimension_numbers = #tpu.dot_dimension_numbers<[1], [0], [0], [1], [0, 0, 1, 1], [], []>} : vector<4x32xf32>, vector<32x256xf32>, vector<4x256xf32> -> vector<4x256xf32>
    %15 = arith.addf %12, %14 : vector<4x256xf32>
    %c0_13 = arith.constant 0 : index
    %c0_14 = arith.constant 0 : index
    %16 = vector.load %arg9[%c0_13, %c0_14] : memref<4x256xf32, #tpu.memory_space<vmem>>, vector<4x256xf32>
    tpu.vector_store %arg9[%c0_13, %c0_14], %15 {strides = array<i32>} : memref<4x256xf32, #tpu.memory_space<vmem>>, vector<4x256xf32>,
    %c0_i32_15 = arith.constant 0 : i32
    %17 = arith.cmpi eq, %arg2, %c0_i32_15 : i32
    %18 = arith.extui %17 : i1 to i32
    %c0_i32_16 = arith.constant 0 : i32
    %19 = arith.cmpi ne, %18, %c0_i32_16 : i32
    scf.if %19 {
      %c0_17 = arith.constant 0 : index
      %c0_18 = arith.constant 0 : index
      %20 = vector.load %arg9[%c0_17, %c0_18] : memref<4x256xf32, #tpu.memory_space<vmem>>, vector<4x256xf32>
      %c0_19 = arith.constant 0 : index
      %c0_20 = arith.constant 0 : index
      %21 = vector.load %arg7[%c0_19, %c0_20] : memref<4x1xf32, #tpu.memory_space<vmem>>, vector<4x1xf32>
      %22 = vector.broadcast %21 : vector<4x1xf32> to vector<4x256xf32>
      %23 = arith.addf %20, %22 : vector<4x256xf32>
      %c0_21 = arith.constant 0 : index
      %c0_22 = arith.constant 0 : index
      %c0_23 = arith.constant 0 : index
      %24 = vector.load %arg8[%c0_21, %c0_22, %c0_23] : memref<1x4x256xf32, #tpu.memory_space<vmem>>, vector<1x4x256xf32>
      %25 = vector.shape_cast %24 : vector<1x4x256xf32> to vector<4x256xf32>
      %26 = vector.shape_cast %23 : vector<4x256xf32> to vector<1x4x256xf32>
      tpu.vector_store %arg8[%c0_21, %c0_22, %c0_23], %26 {strides = array<i32>} : memref<1x4x256xf32, #tpu.memory_space<vmem>>, vector<1x4x256xf32>,
    } else {
    }
    return
  }
  func.func @transform_0(%arg0: i32, %arg1: i32, %arg2: i32) -> (i32, i32, i32) {
    %c0_i32 = arith.constant 0 : i32
    %c0_i32_0 = arith.constant 0 : i32
    return %arg0, %c0_i32, %arg1 : i32, i32, i32
  }
  func.func @transform_1(%arg0: i32, %arg1: i32, %arg2: i32) -> (i32, i32) {
    %c0_i32 = arith.constant 0 : i32
    %c0_i32_0 = arith.constant 0 : i32
    return %arg2, %c0_i32 : i32, i32
  }
  func.func @transform_2(%arg0: i32, %arg1: i32, %arg2: i32) -> (i32, i32) {
    %c0_i32 = arith.constant 0 : i32
    %c0_i32_0 = arith.constant 0 : i32
    return %arg2, %c0_i32 : i32, i32
  }
  func.func @transform_3(%arg0: i32, %arg1: i32, %arg2: i32) -> (i32, i32) {
    %c0_i32 = arith.constant 0 : i32
    %c0_i32_0 = arith.constant 0 : i32
    return %c0_i32, %arg2 : i32, i32
  }
  func.func @transform_4(%arg0: i32, %arg1: i32, %arg2: i32) -> (i32, i32) {
    %c0_i32 = arith.constant 0 : i32
    %c0_i32_0 = arith.constant 0 : i32
    %c0_i32_1 = arith.constant 0 : i32
    return %c0_i32, %c0_i32_0 : i32, i32
  }
  func.func @transform_5(%arg0: i32, %arg1: i32, %arg2: i32) -> (i32, i32, i32) {
    %c0_i32 = arith.constant 0 : i32
    %c0_i32_0 = arith.constant 0 : i32
    return %arg0, %c0_i32, %arg1 : i32, i32, i32
  }
}

</mosaic_0001>

<bundles_post_ra>
// kernel: tpu_custom_call.1
= control target key start
LH: loop header
LB: loop body
LE: loop exit
PB: predicated region body
PF: predicated region fallthrough
CT: control target
= control target key end

     0   :  { %10 = vsyncpa [#allocation4], 0  ;;  %s1066_s0 = inlined_call_operand.vmem [shape: f32[2,4,256], index: 0, kind: input, shape index: {}]   ;;  %s1067_s1 = inlined_call_operand.vmem [shape: f32[32,4], index: 1, kind: input, shape index: {}]   ;;  %s1068_s2 = inlined_call_operand.vmem [shape: f32[32,1], index: 2, kind: input, shape index: {}]   ;;  %s1069_s3 = inlined_call_operand.vmem [shape: f32[4,32], index: 3, kind: input, shape index: {}]   ;;  %s1070_s4 = inlined_call_operand.vmem [shape: f32[4,1], index: 4, kind: input, shape index: {}]   ;;  %s1071_s5 = inlined_call_operand.hbm [shape: f32[2,4,256], index: 5, kind: output, shape index: {}]  }
   0x1   :  { %12 = vsyncpa [#allocation4 + $0x1], 0  ;;  %s924_s18 = smov 0   ;;  %s926_s19 = smov 0  }
   0x2   :  { %s928_s20 = smov 0   ;;  %s930_s21 = smov 0  }
   0x3   :  { %s932_s22 = smov 0   ;;  %s934_s23 = smov 0  }
   0x4 LB: > { %s716_s24 = sadd.s32 4294967295, %s888_s23   ;;  %s717_s25 = sadd.s32 4294967294, %s888_s23   ;;  %s888_s23 = sphi %s934_s23, %s18_s23   ;;  %s884_s22 = sphi %s932_s22, %s1078_s22   ;;  %s880_s21 = sphi %s930_s21, %s1077_s21   ;;  %s876_s20 = sphi %s928_s20, %s1076_s20   ;;  %s872_s19 = sphi %s926_s19, %s1075_s19   ;;  %s868_s18 = sphi %s924_s18, %s1074_s18  }
   0x5   : > { %s37_s26 = sadd.s32 1, %s884_s22  ;;  %s173_s27 = sadd.s32 1, %s876_s20 }
   0x6   : > { %p39_p0 = scmp.ge.s32.totalorder %s37_s26, 2  ;;  %p183_p1 = scmp.ne.s32.totalorder %s876_s20, %s872_s19 }
   0x7   : > { %p184_p2 = scmp.eq.s32.totalorder %s716_s24, 1  ;;  %p189_p3 = scmp.ne.s32.totalorder %s872_s19, %s868_s18 }
   0x8   : > { %s1080_s26 = smov (%p39_p0, %s37_s26), 0  ;;  %p190_p5 = scmp.eq.s32.totalorder %s717_s25, 1 }
   0x9   : > { %p964_p4 = por %p184_p2, %p183_p1  ;;  %s168_s29 = ssub.s32 %s884_s22, %s1080_s26 }
   0xa   : > { %p723_p6 = scmp.ge.s32.totalorder %s888_s23, 1  ;;  %p171_p7 = scmp.eq.s32.totalorder %s168_s29, 0 }
   0xb   : > { %p971_p8 = por %p190_p5, %p189_p3  ;;  %p249_p9 = scmp.lt.s32.totalorder %s888_s23, 3 }
   0xc   : > { %s977_s6 = scalar_select %p171_p7, %s876_s20, %s173_s27  }
   0xd   : > { %p250_p10 = pnand %p723_p6, %p249_p9 }
   0xe   : > { %p296_p11 = scmp.lt.s32.totalorder (!%p250_p10), %s880_s21, 1  ;;  %v890_v0 = vmov (!%p250_p10), 0.0   ;;  %v332_v1 = vld [vmem:[%s1068_s2] sm:$0xff] (!%p250_p10)  ;;  %v891_v2 = vmov (!%p250_p10), 0   ;;  %v334_v3 = vld [vmem:[%s1068_s2 + $0x10] sm:$0xff] (!%p250_p10)  ;;  %v333_v4 = vld [vmem:[%s1068_s2 + $0x8] sm:$0xff] (!%p250_p10)  ;;  %v568_v48 = vlaneseq (!%p250_p10) }
   0xf   : > { %253 = sbr.rel (%p250_p10) target bundleno = 497 (0x1f1), region = 40  ;;  %440 = vmatprep.mubr.f32.mxu0 (!%p250_p10), %v890_v0  ;;  %543 = vmatprep.mubr.f32.mxu1 (!%p250_p10), %v890_v0  ;;  %v335_v5 = vld [vmem:[%s1068_s2 + $0x18] sm:$0xff] (!%p250_p10)  ;;  %vm371_vm0 = vcmask (!%p250_p10), 1043456   ;;  %v327_v8 = vld [vmem:[%s1067_s1] sm:$0xff] (!%p250_p10)  ;;  %vm358_vm1 = vcmask (!%p250_p10), 31744   ;;  %v328_v10 = vld [vmem:[%s1067_s1 + $0x8] sm:$0xff] (!%p250_p10) }
  0x10   : > { %807 = vset.pattern.permute.xlu0 (!%p250_p10), %v891_v2  ;;  %808 = vset.pattern.permute.xlu1 (!%p250_p10), %v891_v2  ;;  %v560_v9 = vld [vmem:[%s1070_s4] sm:$0xf] (!%p250_p10)  ;;  %v329_v11 = vld [vmem:[%s1067_s1 + $0x10] sm:$0xff] (!%p250_p10)  ;;  %v330_v12 = vld [vmem:[%s1067_s1 + $0x18] sm:$0xff] (!%p250_p10)  ;;  %vm475_vm2 = vcmask (!%p250_p10), 261120   ;;  %s292_s17 = sand.u32 (!%p250_p10), 1, %s872_s19  }
  0x11   : > { %338 = vperm.xlu0 (!%p250_p10), %807, %v332_v1   ;;  %348 = vperm.xlu1 (!%p250_p10), %808, %v334_v3   ;;  %v474_v45 = vld [vmem:[%s1069_s3] sm:$0xf] (!%p250_p10)  ;;  %v892_v46 = vmov (!%p250_p10), 839922192   ;;  %v569_v50 = vshrl.u32 (!%p250_p10), %v568_v48, 7  ;;  %s724_s24 = sshll.u32 (!%p250_p10), %s292_s17, 3 }
  0x12   : > { %v566_v47 = vunpack.c.l.s4 (!%p250_p10), %v892_v46  ;;  %s294_s27 = scalar_lea.vmem (!%p250_p10), [#allocation3], %s724_s24  ;;  %s576_s10 = scalar_lea.sflag (!%p250_p10), [#allocation4], %s292_s17 }
  0x13   : > { %s592_s29 = sshll.u32 (!%p250_p10), %s294_s27, 4  ;;  %s1021_s29 = int_to_ptr.vmem [resolvable:$true] %s592_s29 }
  0x14   : > { %v567_v49 = vunpack.c.0.s8 (!%p250_p10), %v566_v47  ;;  %s810_s11 = scalar_lea.vmem (!%p250_p10), %s1021_s29, 128 }
  0x15   : > { %343 = vperm.xlu0 (!%p250_p10), %807, %v333_v4   ;;  %353 = vperm.xlu1 (!%p250_p10), %808, %v335_v5   ;;  %p811_p12 = scmp.ne.s32.totalorder (!%p250_p10), %s1021_s29, %s810_s11 }
  0x16   : > { %s297_s9 = scalar_select %p296_p11, %s880_s21, 1  ;;  %v570_v51 = vsub.s32 %v567_v49, %v569_v50 }
  0x17   : > { %p812_p13 = pnand %p811_p12, %p964_p4 }
  0x18   : > { %s739_s12 = sshll.u32 %s297_s9, 3 }
  0x19   : > { %s303_s25 = scalar_lea.vmem %s1066_s0, %s739_s12  ;;  %563 = vperm.xlu0 %807, %v560_v9   ;;  %p813_p0 = pneg %p812_p13 }
  0x1a   : > { %v331_v6 = vld [vmem:[%s303_s25] sm:$0xff]  ;;  %s740_s25 = sshll.u32 %s880_s21, 7  ;;  %s893_s21 = smov [#allocation3]  }
  0x1b   : > { %v357_v7 = vcombine.high %v331_v6, %v331_v6  ;;  %s1019_s9 = scalar_lea.hbm %s1071_s5, %s740_s25  ;;  %s814_s12 = sshll.u32 %s893_s21, 4  ;;  %s815_s12 = int_to_ptr.vmem [resolvable:$false] %s814_s12 }
  0x1c   : > { %s816_s13 = scalar_lea.vmem %s815_s12, 256  ;;  %p817_p1 = scmp.lt.s32.totalorder %s1021_s29, %s815_s12 }
  0x1d   : > { %727 = vmatprep.subr.msk.mxu0 %vm371_vm0, %v357_v7  ;;  %p818_p2 = scmp.lt.s32.totalorder %s816_s13, %s810_s11 }
  0x1e   : > { %728 = vmatpush1.msk.msra.mxu0 %vm371_vm0, %v331_v6 }
  0x1f   : > { %729 = vmatmul.mubr.msk.f32.vlgmr.msra.gmra.mrb[0].mxu0 %vm358_vm1, %v327_v8  ;;  %p819_p3 = por %p818_p2, %p817_p1 }
  0x20   : > { %446 = vmatprep.mubr.f32.mxu0 %v890_v0 }
  0x21   : > { %p820_p5 = pnand %p819_p3, %p813_p0 }
  0x23   : > { %730 = vmatmul.mubr.msk.f32.gmra.mrb[2].mxu0 %vm358_vm1, %v328_v10 }
  0x24   : > { %452 = vmatprep.mubr.f32.mxu0 %v890_v0 }
  0x27   : > { %731 = vmatmul.mubr.msk.f32.gmra.mrb[4].mxu0 %vm358_vm1, %v329_v11 }
  0x28   : > { %458 = vmatprep.mubr.f32.mxu0 %v890_v0 }
  0x2b   : > { %732 = vmatmul.mubr.msk.f32.gmra.mrb[6].mxu0 %vm358_vm1, %v330_v12 }
  0x90   : > { %v339_v13 = vpop.permute.xlu0 %338  ;;  %v349_v22 = vpop.permute.xlu1 %348 }
  0x94   : > { %v344_v17 = vpop.permute.xlu0 %343  ;;  %v354_v33 = vpop.permute.xlu1 %353 }
  0x98   : > { %v564_v52 = vpop.permute.xlu0 %563 }
  0x99   : > { %v571_v55 = vrot.slane %v564_v52, %v570_v51 }
  0xf2   : > { %v442_v14 = vpop.f32.mrb[0].mxu0 }
  0xf3   : > { %v444_v15 = vpop.f32.mrb[1].mxu0  ;;  %v443_v16 = vadd.f32 %v442_v14, %v339_v13 }
  0xf4   : > { %v445_v18 = vadd.f32 %v444_v15, %v339_v13 }
  0xf5   : > { %v465_v24 = vmax.f32 %v443_v16, 0.0 }
  0xf6   : > { %v448_v19 = vpop.f32.mrb[2].mxu0  ;;  %v466_v26 = vmax.f32 %v445_v18, 0.0 }
  0xf7   : > { %v449_v20 = vadd.f32 %v448_v19, %v344_v17  ;;  %v450_v21 = vpop.f32.mrb[3].mxu0 }
  0xf8   : > { %v451_v23 = vadd.f32 %v450_v21, %v344_v17 }
  0xf9   : > { %v467_v25 = vmax.f32 %v449_v20, 0.0 }
  0xfa   : > { %v468_v27 = vmax.f32 %v451_v23, 0.0  ;;  %v454_v28 = vpop.f32.mrb[4].mxu0 }
  0xfb   : > { %v456_v29 = vpop.f32.mrb[5].mxu0  ;;  %v743_v30 = vpack.c.bf16 %v467_v25, %v465_v24  ;;  %v455_v32 = vadd.f32 %v454_v28, %v349_v22 }
  0xfc   : > { %v741_v31 = vpack.c.bf16 %v468_v27, %v466_v26  ;;  %v457_v34 = vadd.f32 %v456_v29, %v349_v22 }
  0xfd   : > { %v469_v39 = vmax.f32 %v455_v32, 0.0 }
  0xfe   : > { %v460_v35 = vpop.f32.mrb[6].mxu0  ;;  %742 = vmatprep.subr.bf16.mxu1 %v741_v31  ;;  %v470_v41 = vmax.f32 %v457_v34, 0.0 }
  0xff   : > { %v461_v36 = vadd.f32 %v460_v35, %v354_v33  ;;  %v462_v37 = vpop.f32.mrb[7].mxu0  ;;  %744 = vmatpush1.bf16.msra.mxu1 %v743_v30 }
 0x100   : > { %v463_v38 = vadd.f32 %v462_v37, %v354_v33 }
 0x101   : > { %v471_v40 = vmax.f32 %v461_v36, 0.0 }
 0x102   : > { %v472_v42 = vmax.f32 %v463_v38, 0.0 }
 0x103   : > { %v747_v43 = vpack.c.bf16 %v471_v40, %v469_v39 }
 0x104   : > { %v745_v44 = vpack.c.bf16 %v472_v42, %v470_v41 }
 0x106   : > { %746 = vmatprep.subr.bf16.mxu1 %v745_v44 }
 0x107   : > { %748 = vmatpush1.bf16.msra.mxu1 %v747_v43 }
 0x10a   : > { %733 = vmatmul.mubr.msk.f32.vlgmr.msra.gmra.mrb[0].mxu1 %vm475_vm2, %v474_v45 }
 0x1dd   : > { %v545_v53 = vpop.f32.mrb[0].mxu1 }
 0x1de   : > { %v547_v54 = vpop.f32.mrb[1].mxu1 }
 0x1df   : > { %v552_v56 = vcombine.low %v545_v53, %v547_v54 }
 0x1e1   : > { %v573_v57 = vadd.f32 %v571_v55, %v552_v56 }
 0x1e3   : > { %574 = vst [vmem:[%s294_s27] sm:$0xff] %v573_v57 }
 0x1e4   : > { %823 = shalt.err (!%p820_p5)
}
 0x1e5   : > { %s824_s14 = scalar_lea.hbm %s1019_s9, 128  ;;  %s828_s17 = scalar_lea.hbm %s1071_s5, 256 }
 0x1e6   : > { %p825_p6 = scmp.ne.s32.totalorder %s1019_s9, %s824_s14  ;;  %p829_p10 = scmp.lt.u32.totalorder %s1019_s9, %s1071_s5 }
 0x1e7   : > { %p830_p11 = scmp.lt.u32.totalorder %s828_s17, %s824_s14  ;;  %p832_p13 = scmp.lt.u32.totalorder %s824_s14, %s1019_s9 }
 0x1e8   : > { %p826_p7 = pnand %p825_p6, %p964_p4 }
 0x1e9   : > { %p831_p12 = por %p830_p11, %p829_p10 }
 0x1ea   : > { %p827_p9 = pneg %p826_p7 }
 0x1eb   : > { %p833_p0 = por %p832_p13, %p831_p12 }
 0x1ed   : > { %p834_p1 = pnand %p833_p0, %p827_p9 }
 0x1ef   : > { %837 = shalt.err (!%p834_p1)
}
 0x1f0   : > { %749 = dma.vmem_to_hbm [thread:$0]  (%p964_p4), %s1021_s29, 128, %s1019_s9, %s576_s10  }
 0x1f1 PF: > { %p755_p2 = scmp.ge.s32.totalorder %s888_s23, 2  ;;  %s604_s27 = sand.u32 1, %s868_s18  }
 0x1f2   : > { %s605_s7 = scalar_lea.sflag [#allocation4], %s604_s27 }
 0x1f3   : > { %p752_p3 = pnand %p755_p2, %p971_p8 }
 0x1f5   : > { %863 = dma.done.wait (!%p752_p3), %s605_s7, 128  }
 0x1f6   : > { %865 = vsyncadd (!%p752_p3), %s605_s7, 4294967168  ;;  %s18_s23 = sadd.s32 1, %s888_s23   ;;  %s1074_s18 = smov %s872_s19 }
 0x1f7   : > { %p15_p5 = scmp.ge.s32.totalorder %s18_s23, 4   ;;  %s1075_s19 = smov %s876_s20 }
 0x1f8   : > { %s1076_s20 = smov %s977_s6  ;;  %s1077_s21 = smov %s884_s22 }
 0x1f9   : > { %s1078_s22 = smov %s1080_s26  ;;  %17 = sbr.rel (!%p15_p5) target bundleno = 4 (0x4), region = 92 }
 0x200   :  { %610 = vsyncpa [#allocation4], 1 }
 0x201   :  { %612 = vsyncpa [#allocation4 + $0x1], 1 }

</bundles_post_ra>
